<compile_context>
chip_gen: v7x
topology: tpu7x:2x2x1
jax: 0.10.0
libtpu: 0.0.40
codegen_flags: <defaults>
</compile_context>

<pallas_src>
import functools

import jax
import jax.numpy as jnp
from jax.experimental import pallas as pl
from jax.experimental.pallas import tpu as pltpu

_LANE = 128


def _mish_kernel(x_ref, o_ref, *, approx_recip):
    x = x_ref[...].astype(jnp.float32)
    # t = exp(x), clamped so t^2 never overflows f32 in the inactive branch.
    t = jnp.exp(jnp.minimum(x, 20.0))
    num = t * (t + 2.0)
    den = num + 2.0
    if approx_recip:
        frac = num * pl.reciprocal(den, approx=True)  # single EUP vrcp
    else:
        frac = num / den                              # exact divide (f32 I/O)
    y = x * frac
    # For x > 20, tanh(softplus(x)) == 1 to f32 precision -> mish(x) == x.
    o_ref[...] = jnp.where(x > 20.0, x, y).astype(o_ref.dtype)


def _mish_math(x):
    """Plain-jnp version of the kernel math (used only for tiny ragged tails)."""
    xf = x.astype(jnp.float32)
    t = jnp.exp(jnp.minimum(xf, 20.0))
    num = t * (t + 2.0)
    y = xf * (num / (num + 2.0))
    return jnp.where(xf > 20.0, xf, y).astype(x.dtype)


def _num_tensorcores():
    # v7x packs 2 TensorCores behind one JAX device; v5e/v6e expose 1.
    try:
        kind = jax.devices()[0].device_kind.lower()
    except Exception:
        return 1
    return 2 if "v7" in kind else 1


def _mish_2d(x2d, target_block_bytes):
    rows, width = x2d.shape
    dtype = x2d.dtype
    itemsize = jnp.dtype(dtype).itemsize
    # Sublane alignment: 8 for 32-bit, 16 for 16-bit, 32 for 8-bit dtypes.
    sub_align = max(8, 32 // max(1, itemsize))
    num_tc = _num_tensorcores()

    if rows <= sub_align:
        tile_rows = rows  # single full-extent block (allowed: equals array dim)
    else:
        tile_rows = (target_block_bytes // (width * itemsize)) // sub_align * sub_align
        tile_rows = max(sub_align, min(tile_rows, rows // sub_align * sub_align))
        # v7x only: make the number of blocks a multiple of the TC count so the
        # "parallel" grid axis splits evenly across both TensorCores. On 1-TC
        # chips we never force extra grid steps.
        if num_tc >= 2:
            tr = tile_rows
            while tr > sub_align and pl.cdiv(rows, tr) % num_tc != 0:
                tr -= sub_align
            if pl.cdiv(rows, tr) % num_tc == 0:
                tile_rows = tr

    grid = (pl.cdiv(rows, tile_rows),)

    block_bytes = tile_rows * width * itemsize
    # in + out, double-buffered, plus headroom; floor 16 MiB (past v5e's scoped
    # default), cap 48 MiB (v7x physical VMEM is only 64 MiB).
    vmem_limit = int(min(48 * 1024 * 1024,
                         max(16 * 1024 * 1024, 4 * block_bytes + (2 << 20))))

    # Approximate reciprocal only for sub-32-bit I/O: keeps f32 results exact
    # while relieving the EUP on v7x/bf16 where exp + exact divide saturate it.
    use_approx = itemsize < 4
    kernel = functools.partial(_mish_kernel, approx_recip=use_approx)

    return pl.pallas_call(
        kernel,
        out_shape=jax.ShapeDtypeStruct((rows, width), dtype),
        grid=grid,
        in_specs=[pl.BlockSpec((tile_rows, width), lambda i: (i, 0))],
        out_specs=pl.BlockSpec((tile_rows, width), lambda i: (i, 0)),
        compiler_params=pltpu.CompilerParams(
            dimension_semantics=("parallel",),
            vmem_limit_bytes=vmem_limit,
        ),
    )(x2d)


def mish(x, *, target_block_bytes=4 * 1024 * 1024):
    """Elementwise Mish on an arbitrary-shape array via Pallas."""
    orig_shape = x.shape
    n = x.size
    if n == 0:
        return x

    # Widest lane-dense slab width that factors the element count exactly
    # (reshape-only wrapper; partial final row-block is masked by the grid).
    width = None
    for w in (4096, 2048, 1024, 512, 256, 128):
        if n % w == 0:
            width = w
            break

    x_flat = jnp.ravel(x)
    if width is not None:
        out2d = _mish_2d(x_flat.reshape(n // width, width), target_block_bytes)
        return out2d.reshape(orig_shape)

    # Ragged fallback: kernel on the 128-divisible prefix, identical math in
    # plain jnp for the (<128-element) tail. Avoids full-array pad+slice copies.
    n_main = (n // _LANE) * _LANE
    tail_out = _mish_math(x_flat[n_main:])
    if n_main == 0:
        out_flat = tail_out
    else:
        main_out = _mish_2d(x_flat[:n_main].reshape(n_main // _LANE, _LANE),
                            target_block_bytes).reshape(-1)
        out_flat = jnp.concatenate([main_out, tail_out])
    return out_flat.reshape(orig_shape)


def _mish_ref(x):
    xf = x.astype(jnp.float32)
    sp = jnp.maximum(xf, 0.0) + jnp.log1p(jnp.exp(-jnp.abs(xf)))
    return (xf * jnp.tanh(sp)).astype(x.dtype)


if __name__ == "__main__":
    key = jax.random.PRNGKey(0)
    # NCHW, small shapes: batch=2, channels=4, spatial=16x16
    x = jax.random.normal(key, (2, 4, 16, 16), dtype=jnp.float32) * 3.0

    y = mish(x)
    jax.block_until_ready(y)

    y_ref = _mish_ref(x)
    assert y.shape == x.shape and y.dtype == x.dtype
    assert jnp.allclose(y, y_ref, atol=1e-5, rtol=1e-5)

    # bf16 path (exercises the approx-reciprocal variant; bf16-level tolerance).
    xb = x.astype(jnp.bfloat16)
    yb = mish(xb)
    jax.block_until_ready(yb)
    assert yb.shape == xb.shape and yb.dtype == jnp.bfloat16
    assert jnp.allclose(yb.astype(jnp.float32),
                        _mish_ref(xb).astype(jnp.float32),
                        atol=2e-2, rtol=2e-2)

    # Ragged path: kernel on the 128-divisible prefix + jnp tail.
    x2 = jax.random.normal(jax.random.PRNGKey(1), (3, 5, 67), dtype=jnp.float32) * 3.0
    y2 = mish(x2)
    jax.block_until_ready(y2)
    assert y2.shape == x2.shape
    assert jnp.allclose(y2, _mish_ref(x2), atol=1e-5, rtol=1e-5)

    print("KERNEL_OK")
</pallas_src>

<mosaic_0001>
module attributes {stable_mosaic.version = 11 : i64} {
  func.func @_mish_kernel(%arg0: i32, %arg1: memref<1x2048xf32, #tpu.memory_space<vmem>>, %arg2: memref<1x2048xf32, #tpu.memory_space<vmem>>) attributes {dimension_semantics = [#tpu.dimension_semantics<parallel>], iteration_bounds = array<i64: 1>, scalar_prefetch = 0 : i64, scratch_operands = 0 : i64, tpu.core_type = #tpu.core_type<tc>, window_params = [{transform_indices = @transform_0, window_bounds = array<i64: 1, 2048>}, {transform_indices = @transform_1, window_bounds = array<i64: 1, 2048>}]} {
    %c0 = arith.constant 0 : index
    %c0_0 = arith.constant 0 : index
    %0 = vector.load %arg1[%c0, %c0_0] : memref<1x2048xf32, #tpu.memory_space<vmem>>, vector<1x2048xf32>
    %cst = arith.constant 2.000000e+01 : f32
    %1 = vector.broadcast %cst : f32 to vector<1x2048xf32>
    %2 = arith.minimumf %0, %1 : vector<1x2048xf32>
    %3 = math.exp %2 : vector<1x2048xf32>
    %cst_1 = arith.constant 2.000000e+00 : f32
    %4 = vector.broadcast %cst_1 : f32 to vector<1x2048xf32>
    %5 = arith.addf %3, %4 : vector<1x2048xf32>
    %6 = arith.mulf %3, %5 : vector<1x2048xf32>
    %cst_2 = arith.constant 2.000000e+00 : f32
    %7 = vector.broadcast %cst_2 : f32 to vector<1x2048xf32>
    %8 = arith.addf %6, %7 : vector<1x2048xf32>
    %9 = arith.divf %6, %8 : vector<1x2048xf32>
    %10 = arith.mulf %0, %9 : vector<1x2048xf32>
    %cst_3 = arith.constant 2.000000e+01 : f32
    %11 = vector.broadcast %cst_3 : f32 to vector<1x2048xf32>
    %12 = arith.cmpf ogt, %0, %11 : vector<1x2048xf32>
    %13 = arith.select %12, %0, %10 : vector<1x2048xi1>, vector<1x2048xf32>
    %c0_4 = arith.constant 0 : index
    %c0_5 = arith.constant 0 : index
    %14 = vector.load %arg2[%c0_4, %c0_5] : memref<1x2048xf32, #tpu.memory_space<vmem>>, vector<1x2048xf32>
    tpu.vector_store %arg2[%c0_4, %c0_5], %13 {strides = array<i32>} : memref<1x2048xf32, #tpu.memory_space<vmem>>, vector<1x2048xf32>,
    return
  }
  func.func @transform_0(%arg0: i32) -> (i32, i32) {
    %c0_i32 = arith.constant 0 : i32
    %c0_i32_0 = arith.constant 0 : i32
    return %arg0, %c0_i32 : i32, i32
  }
  func.func @transform_1(%arg0: i32) -> (i32, i32) {
    %c0_i32 = arith.constant 0 : i32
    %c0_i32_0 = arith.constant 0 : i32
    return %arg0, %c0_i32 : i32, i32
  }
}

</mosaic_0001>

<bundles_post_ra>
// kernel: tpu_custom_call.1
= control target key start
LH: loop header
LB: loop body
LE: loop exit
PB: predicated region body
PF: predicated region fallthrough
CT: control target
= control target key end

     0   :  { %6 = vsyncpa [#allocation3], 0  ;;  %s156_s0 = inlined_call_operand.hbm [shape: f32[1,2048], index: 0, kind: input, shape index: {}]   ;;  %s157_s1 = inlined_call_operand.hbm [shape: f32[1,2048], index: 1, kind: output, shape index: {}]  }
   0x1   :  { %7 = vsyncpa [#allocation4], 0  ;;  %s120_s6 = smov [#allocation2]   ;;  %s72_s10 = scalar_lea.hbm %s156_s0, 256 }
   0x2   :  { %s14_s7 = sshll.u32 %s120_s6, 4  ;;  %p73_p0 = scmp.ne.s32.totalorder %s156_s0, %s72_s10  ;;  %s15_s7 = int_to_ptr.vmem [resolvable:$true] %s14_s7 }
   0x3   :  { %p76_p1 = scmp.lt.u32.totalorder %s72_s10, %s156_s0 }
   0x5   :  { %p78_p2 = pnand %p76_p1, %p73_p0 }
   0x7   :  { %81 = shalt.err (!%p78_p2)
}
   0x8   :  { %s82_s15 = scalar_lea.vmem %s15_s7, 256  ;;  %p87_p4 = scmp.lt.s32.totalorder %s15_s7, %s15_s7 }
   0x9   :  { %p83_p3 = scmp.ne.s32.totalorder %s15_s7, %s82_s15  ;;  %p88_p5 = scmp.lt.s32.totalorder %s82_s15, %s82_s15 }
   0xb   :  { %p89_p6 = por %p88_p5, %p87_p4 }
   0xd   :  { %p90_p7 = pnand %p89_p6, %p83_p3 }
   0xf   :  { %93 = shalt.err (!%p90_p7)
}
  0x10   :  { %17 = dma.hbm_to_vmem [thread:$0]  %s156_s0, 256, %s15_s7, [#allocation3]  }
  0x11   :  { %116 = dma.done.wait [#allocation3], 256  }
  0x12   :  { %117 = vsyncadd [#allocation3], 4294967040  ;;  %v21_v0 = vld [vmem:[#allocation2] sm:$0xff]  ;;  %v22_v1 = vld [vmem:[#allocation2 + $0x8] sm:$0xff]  ;;  %s121_s0 = smov [#allocation5]  }
  0x13   :  { %v23_v2 = vmin.f32 %v21_v0, 20.0  ;;  %v24_v3 = vmin.f32 %v22_v1, 20.0  ;;  %vm41_vm0 = vcmp.gt.f32.partialorder %v21_v0, 20.0  ;;  %s53_s18 = sshll.u32 %s121_s0, 4  ;;  %vm42_vm1 = vcmp.gt.f32.partialorder %v22_v1, 20.0  ;;  %s54_s18 = int_to_ptr.vmem [resolvable:$true] %s53_s18 }
  0x14   :  { %s94_s19 = scalar_lea.vmem %s54_s18, 256  ;;  %p99_p9 = scmp.lt.s32.totalorder %s54_s18, %s54_s18 }
  0x15   :  { %v25_v4 = vmul.f32 1.442695, %v23_v2  ;;  %v27_v5 = vmul.f32 1.442695, %v24_v3  ;;  %p95_p8 = scmp.ne.s32.totalorder %s54_s18, %s94_s19  ;;  %p100_p10 = scmp.lt.s32.totalorder %s94_s19, %s94_s19 }
  0x17   :  { %64 = vpow2.f32 %v25_v4  ;;  %p101_p11 = por %p100_p10, %p99_p9 }
  0x18   :  { %66 = vpow2.f32 %v27_v5 }
  0x19   :  { %p102_p12 = pnand %p101_p11, %p95_p8 }
  0x21   :  { %v65_v6 = vpop.eup %64 }
  0x22   :  { %v67_v7 = vpop.eup %66  ;;  %v29_v8 = vadd.f32 2.0, %v65_v6 }
  0x23   :  { %v30_v9 = vadd.f32 2.0, %v67_v7 }
  0x24   :  { %v31_v10 = vmul.f32 %v65_v6, %v29_v8 }
  0x25   :  { %v32_v11 = vmul.f32 %v67_v7, %v30_v9 }
  0x26   :  { %v33_v12 = vadd.f32 2.0, %v31_v10 }
  0x27   :  { %v34_v13 = vadd.f32 2.0, %v32_v11 }
  0x28   :  { %68 = vrcp.f32 %v33_v12 }
  0x29   :  { %70 = vrcp.f32 %v34_v13 }
  0x32   :  { %v69_v14 = vpop.eup %68 }
  0x33   :  { %v71_v15 = vpop.eup %70  ;;  %v36_v16 = vmul.f32 %v69_v14, %v31_v10 }
  0x34   :  { %v38_v17 = vmul.f32 %v71_v15, %v32_v11 }
  0x35   :  { %v39_v18 = vmul.f32 %v36_v16, %v21_v0 }
  0x36   :  { %v40_v19 = vmul.f32 %v38_v17, %v22_v1 }
  0x37   :  { %v43_v20 = vsel %vm41_vm0, %v21_v0, %v39_v18 }
  0x38   :  { %45 = vst [vmem:[#allocation5] sm:$0xff] %v43_v20  ;;  %v44_v21 = vsel %vm42_vm1, %v22_v1, %v40_v19 }
  0x39   :  { %46 = vst [vmem:[#allocation5 + $0x8] sm:$0xff] %v44_v21 }
  0x3a   :  { %105 = shalt.err (!%p102_p12)
}
  0x3b   :  { %s106_s22 = scalar_lea.hbm %s157_s1, 256 }
  0x3c   :  { %p107_p13 = scmp.ne.s32.totalorder %s157_s1, %s106_s22  ;;  %p110_p0 = scmp.lt.u32.totalorder %s106_s22, %s157_s1 }
  0x3e   :  { %p112_p1 = pnand %p110_p0, %p107_p13 }
  0x40   :  { %115 = shalt.err (!%p112_p1)
}
  0x41   :  { %56 = dma.vmem_to_hbm [thread:$0]  %s54_s18, 256, %s157_s1, [#allocation4]  }
  0x42   :  { %118 = dma.done.wait [#allocation4], 256  }
  0x43   :  { %119 = vsyncadd [#allocation4], 4294967040 }
  0x44   :  { %60 = vsyncpa [#allocation3], 1 }
  0x45   :  { %61 = vsyncpa [#allocation4], 1 }

</bundles_post_ra>
